<compile_context>
chip_gen: v7x
topology: tpu7x:2x2x1
jax: 0.10.0
libtpu: 0.0.40
codegen_flags: <defaults>
</compile_context>

<pallas_src>
import jax
import jax.numpy as jnp
from jax.experimental import pallas as pl
from jax.experimental.pallas import tpu as pltpu


def _choose_tile_hw(B, C, HW, itemsize, budget_bytes=4 * 1024 * 1024):
    """Largest lane-tile (multiple of 128) whose single buffer fits the budget."""
    per_lane = max(1, B * C * itemsize)
    t = (budget_bytes // per_lane) // 128 * 128
    t = max(128, t)
    hw128 = ((HW + 127) // 128) * 128
    return min(t, hw128)


def _make_kernel(B, C, Cr, HW, T_HW, hw_pad):
    n_groups = T_HW // 128
    needs_mask = (hw_pad != HW)          # static: only the ragged tail needs it
    inv_hw = 1.0 / float(HW)             # precomputed; avoids an EUP divide

    def kernel(x_ref, w1_ref, w2_ref, out_ref, max_acc, sum_acc):
        k = pl.program_id(0)
        n_k = pl.num_programs(0)

        @pl.when(k == 0)
        def _init():
            max_acc[...] = jnp.full((B, C, 128), -jnp.inf, dtype=jnp.float32)
            sum_acc[...] = jnp.zeros((B, C, 128), dtype=jnp.float32)

        # Fold this (B, C, T_HW) tile into the (B, C, 128) accumulators using
        # only elementwise VPU ops (no per-tile cross-lane reduce).
        m = max_acc[...]
        s = sum_acc[...]
        if needs_mask:
            lane = jax.lax.broadcasted_iota(jnp.int32, (B, C, 128), 2)
            valid = HW - k * T_HW  # > T_HW for full tiles -> mask is all-true
        for g in range(n_groups):
            blk = x_ref[:, :, g * 128:(g + 1) * 128].astype(jnp.float32)
            if needs_mask:
                in_bounds = (lane + (g * 128)) < valid
                blk_max = jnp.where(in_bounds, blk, -jnp.inf)
            else:
                blk_max = blk
            m = jnp.maximum(m, blk_max)
            s = s + blk  # wrapper zero-padding keeps the sum exact
        max_acc[...] = m
        sum_acc[...] = s

        @pl.when(k == n_k - 1)
        def _finalize():
            # Single cross-lane reduce, only once, at the end.
            max_pool = jnp.max(max_acc[...], axis=-1)            # (B, C)
            avg_pool = jnp.sum(sum_acc[...], axis=-1) * inv_hw   # (B, C)

            # Fused SE: one pass over the weights for both branches.
            pooled = jnp.concatenate([max_pool, avg_pool], axis=0)  # (2B, C)
            w1 = w1_ref[...].astype(jnp.float32)                    # (C, Cr)
            w2 = w2_ref[...].astype(jnp.float32)                    # (Cr, C)
            h = jnp.dot(pooled, w1, preferred_element_type=jnp.float32)
            h = jnp.maximum(h, 0.0)
            y = jnp.dot(h, w2, preferred_element_type=jnp.float32)  # (2B, C)
            out = jax.nn.sigmoid(y[:B] + y[B:])
            out_ref[...] = out.astype(out_ref.dtype)

    return kernel


def channel_attention(x, w1, w2):
    """x: (B, C, H, W); w1: (C//r, C); w2: (C, C//r)  (PyTorch 1x1-conv layout).

    Returns (B, C, 1, 1), matching the PyTorch module's output.
    """
    B, C, H, W = x.shape
    Cr = w1.shape[0]
    HW = H * W
    itemsize = jnp.dtype(x.dtype).itemsize

    x_flat = x.reshape(B, C, HW)
    T_HW = _choose_tile_hw(B, C, HW, itemsize)
    hw_pad = pl.cdiv(HW, T_HW) * T_HW
    if hw_pad != HW:
        x_flat = jnp.pad(x_flat, ((0, 0), (0, 0), (0, hw_pad - HW)))

    w1_t = jnp.transpose(w1)  # (C, Cr)
    w2_t = jnp.transpose(w2)  # (Cr, C)

    grid = (hw_pad // T_HW,)
    kernel = _make_kernel(B, C, Cr, HW, T_HW, hw_pad)

    cost = pl.CostEstimate(
        flops=2 * B * C * HW + 8 * B * C * Cr,
        transcendentals=B * C,
        bytes_accessed=B * C * hw_pad * itemsize + (2 * C * Cr + B * C) * 4,
    )

    out = pl.pallas_call(
        kernel,
        out_shape=jax.ShapeDtypeStruct((B, C), x.dtype),
        grid_spec=pltpu.PrefetchScalarGridSpec(
            num_scalar_prefetch=0,
            grid=grid,
            in_specs=[
                pl.BlockSpec((B, C, T_HW), lambda k: (0, 0, k)),
                pl.BlockSpec((C, Cr), lambda k: (0, 0)),
                pl.BlockSpec((Cr, C), lambda k: (0, 0)),
            ],
            out_specs=pl.BlockSpec((B, C), lambda k: (0, 0)),
            scratch_shapes=[
                pltpu.VMEM((B, C, 128), jnp.float32),  # running max
                pltpu.VMEM((B, C, 128), jnp.float32),  # running sum
            ],
        ),
        compiler_params=pltpu.CompilerParams(
            dimension_semantics=("arbitrary",),
            vmem_limit_bytes=32 * 1024 * 1024,
        ),
        cost_estimate=cost,
    )(x_flat, w1_t, w2_t)

    # TODO(synk): on v7x a second "parallel" channel-tile grid axis could shard
    # the HBM-bound pooling across both TensorCores; kept single-axis here to
    # keep the SE matmuls fused inside the kernel.
    return out.reshape(B, C, 1, 1)


def reference(x, w1, w2):
    # Pure-JAX reference of the PyTorch forward (NCHW).
    max_pool = jnp.max(x, axis=(2, 3))   # (B, C)
    avg_pool = jnp.mean(x, axis=(2, 3))  # (B, C)

    def se(v):
        h = v @ w1.T
        h = jnp.maximum(h, 0)
        return h @ w2.T

    out = jax.nn.sigmoid(se(max_pool) + se(avg_pool))
    return out[:, :, None, None]


if __name__ == "__main__":
    # Small shapes consistent with the module: channel divisible by reduction.
    B, C, H, W = 2, 64, 16, 16
    reduction = 16
    Cr = C // reduction  # 4

    key = jax.random.PRNGKey(0)
    kx, k1, k2 = jax.random.split(key, 3)

    x = jax.random.normal(kx, (B, C, H, W), dtype=jnp.float32)
    # Deterministic synthetic weights (PyTorch Conv2d weight shapes, squeezed 1x1).
    w1 = jax.random.normal(k1, (Cr, C), dtype=jnp.float32) * (1.0 / jnp.sqrt(C))
    w2 = jax.random.normal(k2, (C, Cr), dtype=jnp.float32) * (1.0 / jnp.sqrt(Cr))

    out = channel_attention(x, w1, w2)
    out = jax.block_until_ready(out)

    ref = reference(x, w1, w2)
    assert out.shape == (B, C, 1, 1), out.shape
    assert jnp.allclose(out, ref, atol=1e-5, rtol=1e-5), (
        f"max abs err {jnp.max(jnp.abs(out - ref))}"
    )

    print("KERNEL_OK")
</pallas_src>

<mosaic_0001>
module attributes {stable_mosaic.version = 11 : i64} {
  func.func @kernel(%arg0: i32, %arg1: memref<2x64x256xf32, #tpu.memory_space<vmem>>, %arg2: memref<64x4xf32, #tpu.memory_space<vmem>>, %arg3: memref<4x64xf32, #tpu.memory_space<vmem>>, %arg4: memref<2x64xf32, #tpu.memory_space<vmem>>, %arg5: memref<2x64x128xf32, #tpu.memory_space<vmem>>, %arg6: memref<2x64x128xf32, #tpu.memory_space<vmem>>) attributes {dimension_semantics = [#tpu.dimension_semantics<arbitrary>], iteration_bounds = array<i64: 1>, scalar_prefetch = 0 : i64, scratch_operands = 2 : i64, tpu.core_type = #tpu.core_type<tc>, window_params = [{transform_indices = @transform_0, window_bounds = array<i64: 2, 64, 256>}, {pipeline_mode = #tpu.pipeline_mode<synchronous>, transform_indices = @transform_1, window_bounds = array<i64: 64, 4>}, {pipeline_mode = #tpu.pipeline_mode<synchronous>, transform_indices = @transform_2, window_bounds = array<i64: 4, 64>}, {pipeline_mode = #tpu.pipeline_mode<synchronous>, transform_indices = @transform_3, window_bounds = array<i64: 2, 64>}]} {
    %c0_i32 = arith.constant 0 : i32
    %0 = arith.cmpi eq, %arg0, %c0_i32 : i32
    %1 = arith.extui %0 : i1 to i32
    %c0_i32_0 = arith.constant 0 : i32
    %2 = arith.cmpi ne, %1, %c0_i32_0 : i32
    scf.if %2 {
      %cst = arith.constant 0xFF800000 : f32
      %16 = vector.broadcast %cst : f32 to vector<2x64x128xf32>
      %c0_19 = arith.constant 0 : index
      %c0_20 = arith.constant 0 : index
      %c0_21 = arith.constant 0 : index
      %17 = vector.load %arg5[%c0_19, %c0_20, %c0_21] : memref<2x64x128xf32, #tpu.memory_space<vmem>>, vector<2x64x128xf32>
      tpu.vector_store %arg5[%c0_19, %c0_20, %c0_21], %16 {strides = array<i32>} : memref<2x64x128xf32, #tpu.memory_space<vmem>>, vector<2x64x128xf32>,
      %cst_22 = arith.constant 0.000000e+00 : f32
      %18 = vector.broadcast %cst_22 : f32 to vector<2x64x128xf32>
      %c0_23 = arith.constant 0 : index
      %c0_24 = arith.constant 0 : index
      %c0_25 = arith.constant 0 : index
      %19 = vector.load %arg6[%c0_23, %c0_24, %c0_25] : memref<2x64x128xf32, #tpu.memory_space<vmem>>, vector<2x64x128xf32>
      tpu.vector_store %arg6[%c0_23, %c0_24, %c0_25], %18 {strides = array<i32>} : memref<2x64x128xf32, #tpu.memory_space<vmem>>, vector<2x64x128xf32>,
    } else {
    }
    %c0 = arith.constant 0 : index
    %c0_1 = arith.constant 0 : index
    %c0_2 = arith.constant 0 : index
    %3 = vector.load %arg5[%c0, %c0_1, %c0_2] : memref<2x64x128xf32, #tpu.memory_space<vmem>>, vector<2x64x128xf32>
    %c0_3 = arith.constant 0 : index
    %c0_4 = arith.constant 0 : index
    %c0_5 = arith.constant 0 : index
    %4 = vector.load %arg6[%c0_3, %c0_4, %c0_5] : memref<2x64x128xf32, #tpu.memory_space<vmem>>, vector<2x64x128xf32>
    %c0_6 = arith.constant 0 : index
    %c0_7 = arith.constant 0 : index
    %c0_8 = arith.constant 0 : index
    %5 = vector.load %arg1[%c0_6, %c0_7, %c0_8] : memref<2x64x256xf32, #tpu.memory_space<vmem>>, vector<2x64x128xf32>
    %6 = arith.maximumf %3, %5 : vector<2x64x128xf32>
    %7 = arith.addf %4, %5 : vector<2x64x128xf32>
    %c0_9 = arith.constant 0 : index
    %c0_10 = arith.constant 0 : index
    %c128 = arith.constant 128 : index
    %8 = vector.load %arg1[%c0_9, %c0_10, %c128] : memref<2x64x256xf32, #tpu.memory_space<vmem>>, vector<2x64x128xf32>
    %9 = arith.maximumf %6, %8 : vector<2x64x128xf32>
    %10 = arith.addf %7, %8 : vector<2x64x128xf32>
    %c0_11 = arith.constant 0 : index
    %c0_12 = arith.constant 0 : index
    %c0_13 = arith.constant 0 : index
    %11 = vector.load %arg5[%c0_11, %c0_12, %c0_13] : memref<2x64x128xf32, #tpu.memory_space<vmem>>, vector<2x64x128xf32>
    tpu.vector_store %arg5[%c0_11, %c0_12, %c0_13], %9 {strides = array<i32>} : memref<2x64x128xf32, #tpu.memory_space<vmem>>, vector<2x64x128xf32>,
    %c0_14 = arith.constant 0 : index
    %c0_15 = arith.constant 0 : index
    %c0_16 = arith.constant 0 : index
    %12 = vector.load %arg6[%c0_14, %c0_15, %c0_16] : memref<2x64x128xf32, #tpu.memory_space<vmem>>, vector<2x64x128xf32>
    tpu.vector_store %arg6[%c0_14, %c0_15, %c0_16], %10 {strides = array<i32>} : memref<2x64x128xf32, #tpu.memory_space<vmem>>, vector<2x64x128xf32>,
    %c0_i32_17 = arith.constant 0 : i32
    %13 = arith.cmpi eq, %arg0, %c0_i32_17 : i32
    %14 = arith.extui %13 : i1 to i32
    %c0_i32_18 = arith.constant 0 : i32
    %15 = arith.cmpi ne, %14, %c0_i32_18 : i32
    scf.if %15 {
      %c0_19 = arith.constant 0 : index
      %c0_20 = arith.constant 0 : index
      %c0_21 = arith.constant 0 : index
      %16 = vector.load %arg5[%c0_19, %c0_20, %c0_21] : memref<2x64x128xf32, #tpu.memory_space<vmem>>, vector<2x64x128xf32>
      %cst = arith.constant dense<0xFF800000> : vector<2x64xf32>
      %17 = vector.multi_reduction <maximumf>, %16, %cst [2] : vector<2x64x128xf32> to vector<2x64xf32>
      %c0_22 = arith.constant 0 : index
      %c0_23 = arith.constant 0 : index
      %c0_24 = arith.constant 0 : index
      %18 = vector.load %arg6[%c0_22, %c0_23, %c0_24] : memref<2x64x128xf32, #tpu.memory_space<vmem>>, vector<2x64x128xf32>
      %cst_25 = arith.constant dense<0.000000e+00> : vector<2x64xf32>
      %19 = vector.multi_reduction <add>, %18, %cst_25 [2] : vector<2x64x128xf32> to vector<2x64xf32>
      %cst_26 = arith.constant 3.906250e-03 : f32
      %20 = vector.broadcast %cst_26 : f32 to vector<2x64xf32>
      %21 = arith.mulf %19, %20 : vector<2x64xf32>
      %22 = tpu.concatenate %17, %21 in 0 : vector<2x64xf32>, vector<2x64xf32> -> vector<4x64xf32>
      %c0_27 = arith.constant 0 : index
      %c0_28 = arith.constant 0 : index
      %23 = vector.load %arg2[%c0_27, %c0_28] : memref<64x4xf32, #tpu.memory_space<vmem>>, vector<64x4xf32>
      %c0_29 = arith.constant 0 : index
      %c0_30 = arith.constant 0 : index
      %24 = vector.load %arg3[%c0_29, %c0_30] : memref<4x64xf32, #tpu.memory_space<vmem>>, vector<4x64xf32>
      %cst_31 = arith.constant dense<0.000000e+00> : vector<4x4xf32>
      %25 = tpu.matmul %22, %23, %cst_31 {dimension_numbers = #tpu.dot_dimension_numbers<[1], [0], [0], [1], [0, 0, 1, 1], [], []>} : vector<4x64xf32>, vector<64x4xf32>, vector<4x4xf32> -> vector<4x4xf32>
      %cst_32 = arith.constant 0.000000e+00 : f32
      %26 = vector.broadcast %cst_32 : f32 to vector<4x4xf32>
      %27 = arith.maximumf %25, %26 : vector<4x4xf32>
      %cst_33 = arith.constant dense<0.000000e+00> : vector<4x64xf32>
      %28 = tpu.matmul %27, %24, %cst_33 {dimension_numbers = #tpu.dot_dimension_numbers<[1], [0], [0], [1], [0, 0, 1, 1], [], []>} : vector<4x4xf32>, vector<4x64xf32>, vector<4x64xf32> -> vector<4x64xf32>
      %29 = vector.extract_strided_slice %28 {offsets = [0, 0], sizes = [2, 64], strides = [1, 1]} : vector<4x64xf32> to vector<2x64xf32>
      %30 = vector.extract_strided_slice %28 {offsets = [2, 0], sizes = [2, 64], strides = [1, 1]} : vector<4x64xf32> to vector<2x64xf32>
      %31 = arith.addf %29, %30 : vector<2x64xf32>
      %32 = arith.negf %31 : vector<2x64xf32>
      %33 = math.exp %32 : vector<2x64xf32>
      %cst_34 = arith.constant 1.000000e+00 : f32
      %34 = vector.broadcast %cst_34 : f32 to vector<2x64xf32>
      %35 = arith.addf %34, %33 : vector<2x64xf32>
      %36 = arith.divf %34, %35 : vector<2x64xf32>
      %c0_35 = arith.constant 0 : index
      %c0_36 = arith.constant 0 : index
      %37 = vector.load %arg4[%c0_35, %c0_36] : memref<2x64xf32, #tpu.memory_space<vmem>>, vector<2x64xf32>
      tpu.vector_store %arg4[%c0_35, %c0_36], %36 {strides = array<i32>} : memref<2x64xf32, #tpu.memory_space<vmem>>, vector<2x64xf32>,
    } else {
    }
    return
  }
  func.func @transform_0(%arg0: i32) -> (i32, i32, i32) {
    %c0_i32 = arith.constant 0 : i32
    %c0_i32_0 = arith.constant 0 : i32
    %c0_i32_1 = arith.constant 0 : i32
    return %c0_i32, %c0_i32_0, %arg0 : i32, i32, i32
  }
  func.func @transform_1(%arg0: i32) -> (i32, i32) {
    %c0_i32 = arith.constant 0 : i32
    %c0_i32_0 = arith.constant 0 : i32
    %c0_i32_1 = arith.constant 0 : i32
    return %c0_i32, %c0_i32_0 : i32, i32
  }
  func.func @transform_2(%arg0: i32) -> (i32, i32) {
    %c0_i32 = arith.constant 0 : i32
    %c0_i32_0 = arith.constant 0 : i32
    %c0_i32_1 = arith.constant 0 : i32
    return %c0_i32, %c0_i32_0 : i32, i32
  }
  func.func @transform_3(%arg0: i32) -> (i32, i32) {
    %c0_i32 = arith.constant 0 : i32
    %c0_i32_0 = arith.constant 0 : i32
    %c0_i32_1 = arith.constant 0 : i32
    return %c0_i32, %c0_i32_0 : i32, i32
  }
}

</mosaic_0001>

<bundles_post_ra>
// kernel: tpu_custom_call.1
= control target key start
LH: loop header
LB: loop body
LE: loop exit
PB: predicated region body
PF: predicated region fallthrough
CT: control target
= control target key end

     0   :  { %8 = vsyncpa [#allocation5], 0  ;;  %s1025_s0 = inlined_call_operand.hbm [shape: f32[2,64,256], index: 0, kind: input, shape index: {}]   ;;  %s1026_s1 = inlined_call_operand.vmem [shape: f32[64,4], index: 1, kind: input, shape index: {}]   ;;  %s1027_s2 = inlined_call_operand.vmem [shape: f32[4,64], index: 2, kind: input, shape index: {}]   ;;  %s1028_s3 = inlined_call_operand.hbm [shape: f32[2,64], index: 3, kind: output, shape index: {}]  }
   0x1   :  { %9 = vsyncpa [#allocation6], 0  ;;  %s851_s12 = smov [#allocation4]   ;;  %s803_s16 = scalar_lea.hbm %s1025_s0, 4096 }
   0x2   :  { %s15_s13 = sshll.u32 %s851_s12, 4  ;;  %p804_p0 = scmp.ne.s32.totalorder %s1025_s0, %s803_s16  ;;  %s16_s13 = int_to_ptr.vmem [resolvable:$true] %s15_s13 }
   0x3   :  { %p807_p1 = scmp.lt.u32.totalorder %s803_s16, %s1025_s0 }
   0x5   :  { %p809_p2 = pnand %p807_p1, %p804_p0 }
   0x7   :  { %812 = shalt.err (!%p809_p2)
}
   0x8   :  { %s813_s21 = scalar_lea.vmem %s16_s13, 4096  ;;  %p818_p4 = scmp.lt.s32.totalorder %s16_s13, %s16_s13 }
   0x9   :  { %p814_p3 = scmp.ne.s32.totalorder %s16_s13, %s813_s21  ;;  %p819_p5 = scmp.lt.s32.totalorder %s813_s21, %s813_s21 }
   0xb   :  { %p820_p6 = por %p819_p5, %p818_p4 }
   0xd   :  { %p821_p7 = pnand %p820_p6, %p814_p3 }
   0xf   :  { %824 = shalt.err (!%p821_p7)
}
  0x10   :  { %s852_s22 = smov 256   ;;  %s853_s23 = smov 16  }
  0x11   :  { %21 = dma.hbm_to_vmem [thread:$0]  %s1025_s0, 4096, %s16_s13, [#allocation5], %s852_s22, %s852_s22, %s853_s23  }
  0x12   :  { %847 = dma.done.wait [#allocation5], 4096  }
  0x13   :  { %848 = vsyncadd [#allocation5], 4294963200  ;;  %v105_v0 = vld [vmem:[#allocation4 + $0x80] sm:$0xff]  ;;  %v153_v1 = vld [vmem:[#allocation4 + $0x88] sm:$0xff]  ;;  %vm855_vm0 = vmmov 0   ;;  %vm367_vm1 = vcmask 130112  }
  0x14   :  { %v97_v2 = vld [vmem:[#allocation4] sm:$0xff]  ;;  %v185_v3 = vadd.f32 %v153_v1, %v105_v0  ;;  %v145_v4 = vld [vmem:[#allocation4 + $0x8] sm:$0xff]  ;;  %v106_v5 = vld [vmem:[#allocation4 + $0x90] sm:$0xff]  ;;  %v169_v21 = vmax.f32 %v105_v0, %v153_v1  ;;  %vm374_vm2 = vcmask 195712   ;;  %vm381_vm3 = vcmask 261312   ;;  %s857_s15 = smov [#allocation7]  }
  0x15   :  { %v154_v6 = vld [vmem:[#allocation4 + $0x98] sm:$0xff]  ;;  %v177_v7 = vadd.f32 %v145_v4, %v97_v2  ;;  %v98_v8 = vld [vmem:[#allocation4 + $0x10] sm:$0xff]  ;;  %v107_v12 = vld [vmem:[#allocation4 + $0xa0] sm:$0xff]  ;;  %v161_v19 = vmax.f32 %v97_v2, %v145_v4  ;;  %vm388_vm4 = vcmask 326912   ;;  %vm395_vm5 = vcmask 392512   ;;  %s732_s16 = sshll.u32 %s857_s15, 4  ;;  %s733_s16 = int_to_ptr.vmem [resolvable:$true] %s732_s16 }
  0x16   :  { %v146_v9 = vld [vmem:[#allocation4 + $0x18] sm:$0xff]  ;;  %308 = vadd.xlane.f32.xlu1 %v185_v3  ;;  %v186_v10 = vadd.f32 %v154_v6, %v106_v5  ;;  %v155_v13 = vld [vmem:[#allocation4 + $0xa8] sm:$0xff]  ;;  %v99_v14 = vld [vmem:[#allocation4 + $0x20] sm:$0xff]  ;;  %v170_v20 = vmax.f32 %v106_v5, %v154_v6  ;;  %v854_v3 = vmov 0.0|0.0   ;;  %vm402_vm6 = vcmask 458112   ;;  %p830_p9 = scmp.lt.s32.totalorder %s733_s16, %s733_s16 }
  0x17   :  { %292 = vadd.xlane.f32.xlu0 %v177_v7  ;;  %v178_v11 = vadd.f32 %v146_v9, %v98_v8  ;;  %v147_v15 = vld [vmem:[#allocation4 + $0x28] sm:$0xff]  ;;  %v187_v16 = vadd.f32 %v155_v13, %v107_v12  ;;  %v162_v18 = vmax.f32 %v98_v8, %v146_v9  ;;  %v108_v22 = vld [vmem:[#allocation4 + $0xb0] sm:$0xff]  ;;  %v156_v23 = vld [vmem:[#allocation4 + $0xb8] sm:$0xff]  ;;  %v171_v28 = vmax.f32 %v107_v12, %v155_v13 }
  0x18   :  { %v179_v17 = vadd.f32 %v147_v15, %v99_v14  ;;  %v100_v24 = vld [vmem:[#allocation4 + $0x30] sm:$0xff]  ;;  %v148_v25 = vld [vmem:[#allocation4 + $0x38] sm:$0xff]  ;;  %v188_v26 = vadd.f32 %v156_v23, %v108_v22  ;;  %v163_v29 = vmax.f32 %v99_v14, %v147_v15  ;;  %v109_v30 = vld [vmem:[#allocation4 + $0xc0] sm:$0xff]  ;;  %v172_v36 = vmax.f32 %v108_v22, %v156_v23  ;;  %780 = vmatprep.subr.bf16.mxu0 %v854_v3 }
  0x19   :  { %v180_v27 = vadd.f32 %v148_v25, %v100_v24  ;;  %v157_v31 = vld [vmem:[#allocation4 + $0xc8] sm:$0xff]  ;;  %v101_v32 = vld [vmem:[#allocation4 + $0x40] sm:$0xff]  ;;  %v164_v37 = vmax.f32 %v100_v24, %v148_v25  ;;  %v110_v38 = vld [vmem:[#allocation4 + $0xd0] sm:$0xff]  ;;  %v856_v13 = vmov 0.0   ;;  %vm409_vm7 = vcmask 523712  }
  0x1a   :  { %310 = vadd.xlane.f32.xlu1 %v186_v10  ;;  %v149_v33 = vld [vmem:[#allocation4 + $0x48] sm:$0xff]  ;;  %v189_v34 = vadd.f32 %v157_v31, %v109_v30  ;;  %v158_v39 = vld [vmem:[#allocation4 + $0xd8] sm:$0xff]  ;;  %v102_v40 = vld [vmem:[#allocation4 + $0x50] sm:$0xff]  ;;  %v173_v44 = vmax.f32 %v109_v30, %v157_v31  ;;  %772 = vmatprep.mubr.msk.f32.mxu0 %vm855_vm0, %v856_v13  ;;  %v356_v30 = vlaneseq  ;;  %vm450_vm8 = vcmask 1041409  }
  0x1b   :  { %294 = vadd.xlane.f32.xlu0 %v178_v11  ;;  %v181_v35 = vadd.f32 %v149_v33, %v101_v32  ;;  %v150_v41 = vld [vmem:[#allocation4 + $0x58] sm:$0xff]  ;;  %v190_v42 = vadd.f32 %v158_v39, %v110_v38  ;;  %v165_v45 = vmax.f32 %v101_v32, %v149_v33  ;;  %v111_v46 = vld [vmem:[#allocation4 + $0xe0] sm:$0xff]  ;;  %v159_v47 = vld [vmem:[#allocation4 + $0xe8] sm:$0xff]  ;;  %v174_v52 = vmax.f32 %v110_v38, %v158_v39 }
  0x1c   :  { %v182_v43 = vadd.f32 %v150_v41, %v102_v40  ;;  %v103_v48 = vld [vmem:[#allocation4 + $0x60] sm:$0xff]  ;;  %v151_v49 = vld [vmem:[#allocation4 + $0x68] sm:$0xff]  ;;  %v191_v50 = vadd.f32 %v159_v47, %v111_v46  ;;  %v166_v53 = vmax.f32 %v102_v40, %v150_v41  ;;  %v112_v54 = vld [vmem:[#allocation4 + $0xf0] sm:$0xff]  ;;  %v175_v60 = vmax.f32 %v111_v46, %v159_v47  ;;  %775 = vmatprep.subr.mxu1 %v856_v13 }
  0x1d   :  { %v183_v51 = vadd.f32 %v151_v49, %v103_v48  ;;  %v160_v55 = vld [vmem:[#allocation4 + $0xf8] sm:$0xff]  ;;  %v104_v56 = vld [vmem:[#allocation4 + $0x70] sm:$0xff]  ;;  %v167_v61 = vmax.f32 %v103_v48, %v151_v49  ;;  %v552_v0 = vld [vmem:[%s1026_s1] sm:$0xff]  ;;  %777 = vmatprep.mubr.msk.f32.mxu1 %vm855_vm0, %v856_v13  ;;  %v357_v33 = vand.u32 127, %v356_v30  ;;  %vm547_vm9 = vcmask 1043459  }
  0x1e   :  { %312 = vadd.xlane.f32.xlu1 %v187_v16  ;;  %v152_v57 = vld [vmem:[#allocation4 + $0x78] sm:$0xff]  ;;  %v192_v58 = vadd.f32 %v160_v55, %v112_v54  ;;  %v176_v62 = vmax.f32 %v112_v54, %v160_v55  ;;  %v553_v1 = vld [vmem:[%s1026_s1 + $0x8] sm:$0xff]  ;;  %v554_v4 = vld [vmem:[%s1026_s1 + $0x10] sm:$0xff]  ;;  %vm550_vm10 = vcmask 1041408   ;;  %vm561_vm11 = vcmask 523264  }
  0x1f   :  { %296 = vadd.xlane.f32.xlu0 %v179_v17  ;;  %v184_v59 = vadd.f32 %v152_v57, %v104_v56  ;;  %v168_v63 = vmax.f32 %v104_v56, %v152_v57  ;;  %v781_v2 = vpack.c.bf16 %v553_v1, %v552_v0  ;;  %v555_v5 = vld [vmem:[%s1026_s1 + $0x18] sm:$0xff]  ;;  %v556_v7 = vld [vmem:[%s1026_s1 + $0x20] sm:$0xff]  ;;  %v557_v8 = vld [vmem:[%s1026_s1 + $0x28] sm:$0xff]  ;;  %v376_v39 = vadd.s32 4294967272, %v357_v33 }
  0x20   :  { %v784_v6 = vpack.c.bf16 %v555_v5, %v554_v4  ;;  %v787_v9 = vpack.c.bf16 %v557_v8, %v556_v7  ;;  %v558_v10 = vld [vmem:[%s1026_s1 + $0x30] sm:$0xff]  ;;  %v559_v11 = vld [vmem:[%s1026_s1 + $0x38] sm:$0xff]  ;;  %v390_v48 = vadd.s32 4294967256, %v357_v33  ;;  %v397_v49 = vadd.s32 4294967248, %v357_v33 }
  0x21   :  { %782 = vmatpush3.bf16.msra.mxu0 %v781_v2  ;;  %v790_v12 = vpack.c.bf16 %v559_v11, %v558_v10  ;;  %vm640_vm12 = vcmask 1043456   ;;  %vm636_vm13 = vcmask 31744   ;;  %vm724_vm14 = vcmask 517120  }
  0x22   :  { %246 = vmax.xlane.f32.xlu1 %v162_v18  ;;  %783 = vmatprep.subr.bf16.mxu0 %v854_v3 }
  0x23   :  { %244 = vmax.xlane.f32.xlu0 %v161_v19 }
  0x25   :  { %785 = vmatpush3.bf16.msra.mxu0 %v784_v6 }
  0x26   :  { %262 = vmax.xlane.f32.xlu1 %v170_v20  ;;  %786 = vmatprep.subr.bf16.mxu0 %v854_v3 }
  0x27   :  { %260 = vmax.xlane.f32.xlu0 %v169_v21 }
  0x29   :  { %788 = vmatpush3.bf16.msra.mxu0 %v787_v9 }
  0x2a   :  { %314 = vadd.xlane.f32.xlu1 %v188_v26  ;;  %789 = vmatprep.subr.bf16.mxu0 %v854_v3 }
  0x2b   :  { %298 = vadd.xlane.f32.xlu0 %v180_v27 }
  0x2d   :  { %791 = vmatpush3.bf16.msra.mxu0 %v790_v12 }
  0x2e   :  { %264 = vmax.xlane.f32.xlu1 %v171_v28 }
  0x2f   :  { %248 = vmax.xlane.f32.xlu0 %v163_v29 }
  0x32   :  { %316 = vadd.xlane.f32.xlu1 %v189_v34 }
  0x33   :  { %300 = vadd.xlane.f32.xlu0 %v181_v35  ;;  %v359_v35 = vshrl.u32 %v356_v30, 7 }
  0x35   :  { %v360_v41 = vsub.s32 %v357_v33, %v359_v35  ;;  %v936_v54 = vsub.s32 %v376_v39, %v359_v35  ;;  %v942_v0 = vsub.s32 %v397_v49, %v359_v35 }
  0x36   :  { %266 = vmax.xlane.f32.xlu1 %v172_v36  ;;  %v362_v36 = vadd.s32 4294967288, %v357_v33 }
  0x37   :  { %250 = vmax.xlane.f32.xlu0 %v164_v37  ;;  %v369_v37 = vadd.s32 4294967280, %v357_v33 }
  0x3a   :  { %318 = vadd.xlane.f32.xlu1 %v190_v42  ;;  %v365_v42 = vsub.s32 %v362_v36, %v359_v35 }
  0x3b   :  { %302 = vadd.xlane.f32.xlu0 %v182_v43  ;;  %v932_v43 = vsub.s32 %v369_v37, %v359_v35 }
  0x3e   :  { %268 = vmax.xlane.f32.xlu1 %v173_v44  ;;  %v383_v44 = vadd.s32 4294967264, %v357_v33 }
  0x3f   :  { %252 = vmax.xlane.f32.xlu0 %v165_v45 }
  0x42   :  { %320 = vadd.xlane.f32.xlu1 %v191_v50 }
  0x43   :  { %304 = vadd.xlane.f32.xlu0 %v183_v51 }
  0x46   :  { %270 = vmax.xlane.f32.xlu1 %v174_v52 }
  0x47   :  { %254 = vmax.xlane.f32.xlu0 %v166_v53 }
  0x4a   :  { %322 = vadd.xlane.f32.xlu1 %v192_v58  ;;  %v938_v58 = vsub.s32 %v383_v44, %v359_v35 }
  0x4b   :  { %306 = vadd.xlane.f32.xlu0 %v184_v59 }
  0x4e   :  { %272 = vmax.xlane.f32.xlu1 %v175_v60  ;;  %v404_v60 = vadd.s32 4294967240, %v357_v33 }
  0x4f   :  { %256 = vmax.xlane.f32.xlu0 %v167_v61 }
  0x52   :  { %274 = vmax.xlane.f32.xlu1 %v176_v62 }
  0x53   :  { %258 = vmax.xlane.f32.xlu0 %v168_v63  ;;  %v940_v63 = vsub.s32 %v390_v48, %v359_v35 }
  0xa3   :  { %v309_v14 = vpop.xlane.xlu1 %308 }
  0xa4   :  { %v293_v15 = vpop.xlane.xlu0 %292  ;;  %v332_v50 = vmul.f32 0.00390625, %v309_v14  ;;  %v952_v14 = vsub.s32 %v404_v60, %v359_v35 }
  0xa5   :  { %v324_v51 = vmul.f32 0.00390625, %v293_v15 }
  0xa6   :  { %v511_v1 = vrot.slane %v332_v50, %v360_v41 }
  0xa7   :  { %v311_v16 = vpop.xlane.xlu1 %310  ;;  %v472_v2 = vrot.slane %v324_v51, %v360_v41 }
  0xa8   :  { %v295_v17 = vpop.xlane.xlu0 %294  ;;  %v333_v46 = vmul.f32 0.00390625, %v311_v16 }
  0xa9   :  { %v325_v47 = vmul.f32 0.00390625, %v295_v17 }
  0xaa   :  { %v515_v61 = vrot.slane %v333_v46, %v365_v42 }
  0xab   :  { %v313_v18 = vpop.xlane.xlu1 %312  ;;  %v476_v62 = vrot.slane %v325_v47, %v365_v42 }
  0xac   :  { %v297_v19 = vpop.xlane.xlu0 %296  ;;  %v334_v52 = vmul.f32 0.00390625, %v313_v18  ;;  %v516_v15 = vsel %vm367_vm1, %v515_v61, %v511_v1 }
  0xad   :  { %v326_v53 = vmul.f32 0.00390625, %v297_v19  ;;  %v477_v16 = vsel %vm367_vm1, %v476_v62, %v472_v2 }
  0xae   :  { %v520_v3 = vrot.slane %v334_v52, %v932_v43 }
  0xaf   :  { %v914_v20 = vpop.xlane.xlu1 %246  ;;  %v481_v4 = vrot.slane %v326_v53, %v932_v43 }
  0xb0   :  { %v916_v21 = vpop.xlane.xlu0 %244  ;;  %v366_v5 = vrot.slane %v914_v20, %v365_v42  ;;  %v521_v19 = vsel %vm374_vm2, %v520_v3, %v516_v15 }
  0xb1   :  { %v361_v6 = vrot.slane %v916_v21, %v360_v41  ;;  %v482_v20 = vsel %vm374_vm2, %v481_v4, %v477_v16  ;;  %v560_v16 = vld [vmem:[%s1027_s2] sm:$0xf]  ;;  %s825_s2 = scalar_lea.vmem %s733_s16, 32 }
  0xb2   :  { %776 = vmatpush3.msk.msra.mxu1 %vm640_vm12, %v560_v16  ;;  %p826_p8 = scmp.ne.s32.totalorder %s733_s16, %s825_s2  ;;  %p831_p10 = scmp.lt.s32.totalorder %s825_s2, %s825_s2 }
  0xb3   :  { %v918_v22 = vpop.xlane.xlu1 %262 }
  0xb4   :  { %v920_v23 = vpop.xlane.xlu0 %260  ;;  %v418_v7 = vrot.slane %v918_v22, %v365_v42  ;;  %p832_p11 = por %p831_p10, %p830_p9 }
  0xb5   :  { %v414_v8 = vrot.slane %v920_v23, %v360_v41  ;;  %v368_v23 = vsel %vm367_vm1, %v366_v5, %v361_v6 }
  0xb6   :  { %p833_p12 = pnand %p832_p11, %p826_p8 }
  0xb7   :  { %v315_v24 = vpop.xlane.xlu1 %314 }
  0xb8   :  { %v299_v25 = vpop.xlane.xlu0 %298  ;;  %v335_v56 = vmul.f32 0.00390625, %v315_v24  ;;  %v419_v24 = vsel %vm367_vm1, %v418_v7, %v414_v8 }
  0xb9   :  { %v327_v57 = vmul.f32 0.00390625, %v299_v25 }
  0xba   :  { %v525_v10 = vrot.slane %v335_v56, %v936_v54 }
  0xbb   :  { %v922_v26 = vpop.xlane.xlu1 %264  ;;  %v486_v11 = vrot.slane %v327_v57, %v936_v54 }
  0xbc   :  { %v924_v27 = vpop.xlane.xlu0 %248  ;;  %v423_v17 = vrot.slane %v922_v26, %v932_v43  ;;  %v526_v33 = vsel %vm381_vm3, %v525_v10, %v521_v19 }
  0xbd   :  { %v373_v21 = vrot.slane %v924_v27, %v932_v43  ;;  %v487_v26 = vsel %vm381_vm3, %v486_v11, %v482_v20 }
  0xbe   :  { %v424_v37 = vsel %vm374_vm2, %v423_v17, %v419_v24 }
  0xbf   :  { %v317_v28 = vpop.xlane.xlu1 %316 }
  0xc0   :  { %v301_v29 = vpop.xlane.xlu0 %300  ;;  %v336_v12 = vmul.f32 0.00390625, %v317_v28 }
  0xc1   :  { %v328_v18 = vmul.f32 0.00390625, %v301_v29 }
  0xc2   :  { %v530_v29 = vrot.slane %v336_v12, %v938_v58 }
  0xc3   :  { %v926_v31 = vpop.xlane.xlu1 %266  ;;  %v491_v27 = vrot.slane %v328_v18, %v938_v58 }
  0xc4   :  { %v928_v32 = vpop.xlane.xlu0 %250  ;;  %v428_v41 = vrot.slane %v926_v31, %v936_v54  ;;  %v531_v50 = vsel %vm388_vm4, %v530_v29, %v526_v33 }
  0xc5   :  { %v380_v42 = vrot.slane %v928_v32, %v936_v54  ;;  %v492_v53 = vsel %vm388_vm4, %v491_v27, %v487_v26 }
  0xc7   :  { %v319_v34 = vpop.xlane.xlu1 %318 }
  0xc8   :  { %v303_v38 = vpop.xlane.xlu0 %302  ;;  %v337_v22 = vmul.f32 0.00390625, %v319_v34 }
  0xc9   :  { %v329_v25 = vmul.f32 0.00390625, %v303_v38  ;;  %v375_v38 = vsel %vm374_vm2, %v373_v21, %v368_v23 }
  0xca   :  { %v535_v43 = vrot.slane %v337_v22, %v940_v63  ;;  %v382_v56 = vsel %vm381_vm3, %v380_v42, %v375_v38 }
  0xcb   :  { %v930_v40 = vpop.xlane.xlu1 %268  ;;  %v496_v44 = vrot.slane %v329_v25, %v940_v63 }
  0xcc   :  { %v934_v45 = vpop.xlane.xlu0 %252  ;;  %v433_v46 = vrot.slane %v930_v40, %v938_v58  ;;  %v536_v57 = vsel %vm395_vm5, %v535_v43, %v531_v50 }
  0xcd   :  { %v387_v47 = vrot.slane %v934_v45, %v938_v58 }
  0xcf   :  { %v321_v55 = vpop.xlane.xlu1 %320  ;;  %v389_v61 = vsel %vm388_vm4, %v387_v47, %v382_v56 }
  0xd0   :  { %v305_v59 = vpop.xlane.xlu0 %304  ;;  %v338_v28 = vmul.f32 0.00390625, %v321_v55  ;;  %v429_v55 = vsel %vm381_vm3, %v428_v41, %v424_v37 }
  0xd1   :  { %v330_v35 = vmul.f32 0.00390625, %v305_v59  ;;  %v497_v59 = vsel %vm395_vm5, %v496_v44, %v492_v53  ;;  %v434_v60 = vsel %vm388_vm4, %v433_v46, %v429_v55 }
  0xd2   :  { %v540_v48 = vrot.slane %v338_v28, %v942_v0 }
  0xd3   :  { %v271_v9 = vpop.xlane.xlu1 %270  ;;  %v501_v31 = vrot.slane %v330_v35, %v942_v0 }
  0xd4   :  { %v255_v13 = vpop.xlane.xlu0 %254  ;;  %v438_v51 = vrot.slane %v271_v9, %v940_v63  ;;  %v541_v62 = vsel %vm402_vm6, %v540_v48, %v536_v57 }
  0xd5   :  { %v394_v32 = vrot.slane %v255_v13, %v940_v63  ;;  %v502_v1 = vsel %vm402_vm6, %v501_v31, %v497_v59 }
  0xd6   :  { %v439_v2 = vsel %vm395_vm5, %v438_v51, %v434_v60 }
  0xd7   :  { %v323_v30 = vpop.xlane.xlu1 %322  ;;  %v396_v3 = vsel %vm395_vm5, %v394_v32, %v389_v61 }
  0xd8   :  { %v307_v36 = vpop.xlane.xlu0 %306  ;;  %v339_v34 = vmul.f32 0.00390625, %v323_v30 }
  0xd9   :  { %v331_v39 = vmul.f32 0.00390625, %v307_v36 }
  0xda   :  { %v545_v54 = vrot.slane %v339_v34, %v952_v14 }
  0xdb   :  { %v273_v49 = vpop.xlane.xlu1 %272  ;;  %v506_v40 = vrot.slane %v331_v39, %v952_v14 }
  0xdc   :  { %v257_v52 = vpop.xlane.xlu0 %256  ;;  %v443_v45 = vrot.slane %v273_v49, %v942_v0 }
  0xdd   :  { %v401_v58 = vrot.slane %v257_v52, %v942_v0  ;;  %v546_v0 = vsel %vm409_vm7, %v545_v54, %v541_v62  ;;  %v507_v6 = vsel %vm409_vm7, %v506_v40, %v502_v1 }
  0xde   :  { %v444_v7 = vsel %vm402_vm6, %v443_v45, %v439_v2  ;;  %v548_v13 = vsel %vm547_vm9, %v546_v0, %v507_v6 }
  0xdf   :  { %v275_v63 = vpop.xlane.xlu1 %274  ;;  %v403_v9 = vsel %vm402_vm6, %v401_v58, %v396_v3 }
  0xe0   :  { %v448_v4 = vrot.slane %v275_v63, %v952_v14  ;;  %v259_v5 = vpop.xlane.xlu0 %258 }
  0xe1   :  { %v408_v8 = vrot.slane %v259_v5, %v952_v14 }
  0xe2   :  { %v449_v10 = vsel %vm409_vm7, %v448_v4, %v444_v7 }
  0xe3   :  { %v410_v11 = vsel %vm409_vm7, %v408_v8, %v403_v9 }
  0xe4   :  { %v451_v12 = vsel %vm450_vm8, %v449_v10, %v410_v11 }
  0xe5   :  { %v551_v15 = vsel %vm550_vm10, %v451_v12, %v548_v13 }
  0xe6   :  { %773 = vmatmul.mubr.msk.f32.vlgmr.msra.gmra.mrb[0].mxu0 %vm561_vm11, %v551_v15 }
 0x1b9   :  { %v631_v14 = vpop.f32.mrb[0].mxu0 }
 0x1ba   :  { %v635_v17 = vmax.f32 %v631_v14, 0.0  ;;  %v774_v18 = vpop.f32.mrb[1].mxu0 }
 0x1bc   :  { %778 = vmatmul.mubr.msk.f32.vlgmr.msra.gmra.mrb[0].mxu1 %vm636_vm13, %v635_v17 }
 0x28f   :  { %v710_v19 = vpop.f32.mrb[0].mxu1 }
 0x290   :  { %v715_v20 = vrot.slane %v710_v19, 2  ;;  %v779_v21 = vpop.f32.mrb[1].mxu1 }
 0x292   :  { %v717_v22 = vadd.f32 %v715_v20, %v710_v19 }
 0x294   :  { %v744_v23 = vmul.f32 -1.442695, %v717_v22 }
 0x296   :  { %799 = vpow2.f32 %v744_v23 }
 0x2a0   :  { %v800_v24 = vpop.eup %799 }
 0x2a1   :  { %v721_v25 = vadd.f32 1.0, %v800_v24 }
 0x2a3   :  { %801 = vrcp.f32 %v721_v25 }
 0x2ad   :  { %v802_v28 = vpop.eup %801 }
 0x2ae   :  { %725 = vst.msk [vmem:[#allocation7] sm:$0x3] %vm724_vm14, %v802_v28 }
 0x2af   :  { %836 = shalt.err (!%p833_p12)
}
 0x2b0   :  { %s837_s19 = scalar_lea.hbm %s1028_s3, 32 }
 0x2b1   :  { %p838_p13 = scmp.ne.s32.totalorder %s1028_s3, %s837_s19  ;;  %p841_p0 = scmp.lt.u32.totalorder %s837_s19, %s1028_s3 }
 0x2b3   :  { %p843_p1 = pnand %p841_p0, %p838_p13 }
 0x2b5   :  { %846 = shalt.err (!%p843_p1)
}
 0x2b6   :  { %735 = dma.vmem_to_hbm [thread:$0]  %s733_s16, 32, %s1028_s3, [#allocation6]  }
 0x2b7   :  { %849 = dma.done.wait [#allocation6], 32  }
 0x2b8   :  { %850 = vsyncadd [#allocation6], 4294967264 }
 0x2b9   :  { %739 = vsyncpa [#allocation5], 1 }
 0x2ba   :  { %740 = vsyncpa [#allocation6], 1 }

</bundles_post_ra>
